<compile_context>
chip_gen: v5e
topology: v5e:2x2
jax: 0.10.0
libtpu: 0.0.40
codegen_flags: <defaults>
</compile_context>

<pallas_src>
import jax
import jax.numpy as jnp
from jax.experimental import pallas as pl
from jax.experimental.pallas import tpu as pltpu

H_DIM = 128
N_HIDDEN_LAYERS = 6
BN_EPS = 1e-5


def _cdiv(a: int, b: int) -> int:
    return -(-a // b)


def _round_up(n: int, m: int) -> int:
    return ((n + m - 1) // m) * m


def _chip_config():
    """Per-generation tiling / VMEM limits (safe conservative fallback)."""
    kind = ""
    try:
        kind = jax.devices()[0].device_kind.lower()
    except Exception:
        pass
    if "v5" in kind or "v6" in kind:
        # 128 MiB physical VMEM, 1 TensorCore: big tiles, generous scoped limit.
        return {"tb_max": 4096, "vmem_limit": 64 << 20, "min_tiles": 1}
    # v7x (64 MiB VMEM, 2 TensorCores) or unknown: conservative limit, and keep
    # >= 2 grid steps so the "parallel" batch axis uses both cores.
    return {"tb_max": 2048, "vmem_limit": 48 << 20, "min_tiles": 2}


def _mlp_kernel(x_ref, w1_ref, b1_ref, wh_ref, bh_ref, wo_ref, bo_ref, o_ref):
    # First Linear (BatchNorm already folded into w1/b1 by the wrapper) + ReLU.
    # Matmuls run in bf16 with f32 MXU accumulation; bias/ReLU stay in f32.
    h = jnp.dot(x_ref[...].astype(jnp.bfloat16), w1_ref[...],
                preferred_element_type=jnp.float32) + b1_ref[...]
    h = jnp.maximum(h, 0.0)

    # 6 x [Linear(128,128) + ReLU], statically unrolled; each weight slab is
    # read from the resident VMEM block.
    for i in range(N_HIDDEN_LAYERS):
        h = jnp.dot(h.astype(jnp.bfloat16), wh_ref[i],
                    preferred_element_type=jnp.float32) + bh_ref[i]
        h = jnp.maximum(h, 0.0)

    # Output Linear; wo/bo are lane-padded to a multiple of 128 -> unmasked store.
    o_ref[...] = (jnp.dot(h.astype(jnp.bfloat16), wo_ref[...],
                          preferred_element_type=jnp.float32)
                  + bo_ref[...]).astype(o_ref.dtype)


def net_forward(x, params, *, tb_max: int | None = None):
    """x: [B, inp_dim] float32. params: dict of weights (see init_params)."""
    B, inp_dim = x.shape
    outp_dim = params["wo"].shape[1]

    cfg = _chip_config()
    if tb_max is None:
        tb_max = cfg["tb_max"]

    # ---- BatchNorm1d stats over the FULL batch (training mode: biased var),
    #      computed in plain XLA, then folded into the first Linear. ----
    mean = jnp.mean(x, axis=0, keepdims=True)                    # [1, inp_dim]
    var = jnp.mean((x - mean) ** 2, axis=0, keepdims=True)       # biased variance
    scale = params["gamma"] * jax.lax.rsqrt(var + BN_EPS)        # [1, inp_dim]
    shift = params["beta"] - mean * scale                        # [1, inp_dim]
    w1_f = (scale.reshape(inp_dim, 1) * params["w1"]).astype(jnp.bfloat16)
    b1_f = params["b1"] + shift @ params["w1"]                   # [1, H_DIM] f32

    wh_b = params["wh"].astype(jnp.bfloat16)                     # [6, 128, 128]
    bh_f = params["bh"]                                          # [6, 1, 128] f32

    # ---- Lane-dense output: pad W_out / b_out columns to a multiple of 128. ----
    out_pad = _round_up(max(outp_dim, 1), 128)
    wo_p = jnp.pad(params["wo"], ((0, 0), (0, out_pad - outp_dim))).astype(jnp.bfloat16)
    bo_p = jnp.pad(params["bo"], ((0, 0), (0, out_pad - outp_dim)))  # f32

    # ---- Batch tiling: bound pad waste to a few rows per tile, keep tiles fat
    #      to amortize the per-grid-step overhead, and (on v7x) keep >=2 steps
    #      so both TensorCores get work. ----
    min_tiles = cfg["min_tiles"] if B >= 16 else 1
    n_tiles = max(_cdiv(B, tb_max), min_tiles)
    tb = _round_up(_cdiv(B, n_tiles), 8)
    grid_steps = _cdiv(B, tb)
    padded_b = grid_steps * tb
    if padded_b != B:
        # Pad AFTER stats; pad amount is < 8 * n_tiles rows (negligible copy).
        x_in = jnp.pad(x, ((0, padded_b - B), (0, 0)))
    else:
        x_in = x

    out = pl.pallas_call(
        _mlp_kernel,
        out_shape=jax.ShapeDtypeStruct((padded_b, out_pad), jnp.float32),
        grid_spec=pl.GridSpec(
            grid=(grid_steps,),
            in_specs=[
                pl.BlockSpec((tb, inp_dim), lambda i: (i, 0)),                       # x tile
                pl.BlockSpec((inp_dim, H_DIM), lambda i: (0, 0)),                    # W1 (folded, bf16)
                pl.BlockSpec((1, H_DIM), lambda i: (0, 0)),                          # b1 (folded, f32)
                pl.BlockSpec((N_HIDDEN_LAYERS, H_DIM, H_DIM), lambda i: (0, 0, 0)),  # hidden Ws (bf16)
                pl.BlockSpec((N_HIDDEN_LAYERS, 1, H_DIM), lambda i: (0, 0, 0)),      # hidden bs (f32)
                pl.BlockSpec((H_DIM, out_pad), lambda i: (0, 0)),                    # W_out (padded, bf16)
                pl.BlockSpec((1, out_pad), lambda i: (0, 0)),                        # b_out (padded, f32)
            ],
            out_specs=pl.BlockSpec((tb, out_pad), lambda i: (i, 0)),
        ),
        compiler_params=pltpu.CompilerParams(
            dimension_semantics=("parallel",),      # megacore sharding on v7x
            vmem_limit_bytes=cfg["vmem_limit"],
        ),
    )(x_in, w1_f, b1_f, wh_b, bh_f, wo_p, bo_p)

    return out[:B, :outp_dim]


def init_params(key, inp_dim, outp_dim):
    """Deterministic synthetic init (PyTorch-style uniform fan-in scaling)."""
    keys = jax.random.split(key, 4 + 2 * N_HIDDEN_LAYERS)

    def linear_init(kw, kb, fan_in, fan_out):
        bound = 1.0 / jnp.sqrt(jnp.float32(fan_in))
        w = jax.random.uniform(kw, (fan_in, fan_out), jnp.float32, -bound, bound)
        b = jax.random.uniform(kb, (1, fan_out), jnp.float32, -bound, bound)
        return w, b

    w1, b1 = linear_init(keys[0], keys[1], inp_dim, H_DIM)
    whs, bhs = [], []
    for i in range(N_HIDDEN_LAYERS):
        w, b = linear_init(keys[2 + 2 * i], keys[3 + 2 * i], H_DIM, H_DIM)
        whs.append(w)
        bhs.append(b)
    wo, bo = linear_init(keys[-2], keys[-1], H_DIM, outp_dim)

    return {
        "gamma": jnp.ones((1, inp_dim), jnp.float32),   # BatchNorm1d weight init
        "beta": jnp.zeros((1, inp_dim), jnp.float32),   # BatchNorm1d bias init
        "w1": w1, "b1": b1,
        "wh": jnp.stack(whs, axis=0),                   # [6, 128, 128]
        "bh": jnp.stack(bhs, axis=0),                   # [6, 1, 128]
        "wo": wo, "bo": bo,
    }


def net_reference(x, params):
    """Pure-JAX f32 reference (mirrors torch training-mode forward)."""
    mean = jnp.mean(x, axis=0, keepdims=True)
    var = jnp.mean((x - mean) ** 2, axis=0, keepdims=True)
    h = (x - mean) / jnp.sqrt(var + BN_EPS) * params["gamma"] + params["beta"]
    h = jnp.maximum(h @ params["w1"] + params["b1"], 0.0)
    for i in range(N_HIDDEN_LAYERS):
        h = jnp.maximum(h @ params["wh"][i] + params["bh"][i], 0.0)
    return h @ params["wo"] + params["bo"]


if __name__ == "__main__":
    B, INP_DIM, OUTP_DIM = 8, 8, 4

    key = jax.random.PRNGKey(0)
    k_x, k_p = jax.random.split(key)
    x = jax.random.normal(k_x, (B, INP_DIM), jnp.float32)
    params = init_params(k_p, INP_DIM, OUTP_DIM)

    out = jax.block_until_ready(net_forward(x, params))
    ref = net_reference(x, params)
    assert out.shape == (B, OUTP_DIM)
    # bf16 matmul chain (f32 accumulate) vs f32 reference: loosened tolerance.
    assert jnp.allclose(out, ref, atol=5e-2, rtol=5e-2), "Pallas output mismatch vs JAX reference"

    # Also exercise the tiled / padded path (batch not a multiple of the tile,
    # and large enough to use >1 grid step on the v7x config).
    B2 = 600
    x2 = jax.random.normal(jax.random.PRNGKey(1), (B2, INP_DIM), jnp.float32)
    out2 = jax.block_until_ready(net_forward(x2, params))
    ref2 = net_reference(x2, params)
    assert out2.shape == (B2, OUTP_DIM)
    assert jnp.allclose(out2, ref2, atol=5e-2, rtol=5e-2), "Pallas tiled-path mismatch"

    print("KERNEL_OK")
</pallas_src>

<mosaic_0001>
module attributes {stable_mosaic.version = 11 : i64} {
  func.func @_mlp_kernel(%arg0: i32, %arg1: memref<8x8xf32, #tpu.memory_space<vmem>>, %arg2: memref<8x128xbf16, #tpu.memory_space<vmem>>, %arg3: memref<1x128xf32, #tpu.memory_space<vmem>>, %arg4: memref<6x128x128xbf16, #tpu.memory_space<vmem>>, %arg5: memref<6x1x128xf32, #tpu.memory_space<vmem>>, %arg6: memref<128x128xbf16, #tpu.memory_space<vmem>>, %arg7: memref<1x128xf32, #tpu.memory_space<vmem>>, %arg8: memref<8x128xf32, #tpu.memory_space<vmem>>) attributes {dimension_semantics = [#tpu.dimension_semantics<parallel>], iteration_bounds = array<i64: 1>, scalar_prefetch = 0 : i64, scratch_operands = 0 : i64, tpu.core_type = #tpu.core_type<tc>, window_params = [{transform_indices = @transform_0, window_bounds = array<i64: 8, 8>}, {pipeline_mode = #tpu.pipeline_mode<synchronous>, transform_indices = @transform_1, window_bounds = array<i64: 8, 128>}, {pipeline_mode = #tpu.pipeline_mode<synchronous>, transform_indices = @transform_2, window_bounds = array<i64: 1, 128>}, {pipeline_mode = #tpu.pipeline_mode<synchronous>, transform_indices = @transform_3, window_bounds = array<i64: 6, 128, 128>}, {pipeline_mode = #tpu.pipeline_mode<synchronous>, transform_indices = @transform_4, window_bounds = array<i64: 6, 1, 128>}, {pipeline_mode = #tpu.pipeline_mode<synchronous>, transform_indices = @transform_5, window_bounds = array<i64: 128, 128>}, {pipeline_mode = #tpu.pipeline_mode<synchronous>, transform_indices = @transform_6, window_bounds = array<i64: 1, 128>}, {transform_indices = @transform_7, window_bounds = array<i64: 8, 128>}]} {
    %c0 = arith.constant 0 : index
    %c0_0 = arith.constant 0 : index
    %0 = vector.load %arg1[%c0, %c0_0] : memref<8x8xf32, #tpu.memory_space<vmem>>, vector<8x8xf32>
    %1 = arith.truncf %0 : vector<8x8xf32> to vector<8x8xbf16>
    %c0_1 = arith.constant 0 : index
    %c0_2 = arith.constant 0 : index
    %2 = vector.load %arg2[%c0_1, %c0_2] : memref<8x128xbf16, #tpu.memory_space<vmem>>, vector<8x128xbf16>
    %cst = arith.constant dense<0.000000e+00> : vector<8x128xf32>
    %3 = tpu.matmul %1, %2, %cst {dimension_numbers = #tpu.dot_dimension_numbers<[1], [0], [0], [1], [0, 0, 1, 1], [], []>} : vector<8x8xbf16>, vector<8x128xbf16>, vector<8x128xf32> -> vector<8x128xf32>
    %c0_3 = arith.constant 0 : index
    %c0_4 = arith.constant 0 : index
    %4 = vector.load %arg3[%c0_3, %c0_4] : memref<1x128xf32, #tpu.memory_space<vmem>>, vector<1x128xf32>
    %5 = vector.broadcast %4 : vector<1x128xf32> to vector<8x128xf32>
    %6 = arith.addf %3, %5 : vector<8x128xf32>
    %cst_5 = arith.constant 0.000000e+00 : f32
    %7 = vector.broadcast %cst_5 : f32 to vector<8x128xf32>
    %8 = arith.maximumf %6, %7 : vector<8x128xf32>
    %9 = arith.truncf %8 : vector<8x128xf32> to vector<8x128xbf16>
    %c0_6 = arith.constant 0 : index
    %c0_7 = arith.constant 0 : index
    %c0_8 = arith.constant 0 : index
    %10 = vector.load %arg4[%c0_6, %c0_7, %c0_8] : memref<6x128x128xbf16, #tpu.memory_space<vmem>>, vector<1x128x128xbf16>
    %11 = vector.shape_cast %10 : vector<1x128x128xbf16> to vector<128x128xbf16>
    %cst_9 = arith.constant dense<0.000000e+00> : vector<8x128xf32>
    %12 = tpu.matmul %9, %11, %cst_9 {dimension_numbers = #tpu.dot_dimension_numbers<[1], [0], [0], [1], [0, 0, 1, 1], [], []>} : vector<8x128xbf16>, vector<128x128xbf16>, vector<8x128xf32> -> vector<8x128xf32>
    %c0_10 = arith.constant 0 : index
    %c0_11 = arith.constant 0 : index
    %c0_12 = arith.constant 0 : index
    %13 = vector.load %arg5[%c0_10, %c0_11, %c0_12] : memref<6x1x128xf32, #tpu.memory_space<vmem>>, vector<1x1x128xf32>
    %14 = vector.shape_cast %13 : vector<1x1x128xf32> to vector<1x128xf32>
    %15 = vector.broadcast %14 : vector<1x128xf32> to vector<8x128xf32>
    %16 = arith.addf %12, %15 : vector<8x128xf32>
    %cst_13 = arith.constant 0.000000e+00 : f32
    %17 = vector.broadcast %cst_13 : f32 to vector<8x128xf32>
    %18 = arith.maximumf %16, %17 : vector<8x128xf32>
    %19 = arith.truncf %18 : vector<8x128xf32> to vector<8x128xbf16>
    %c1 = arith.constant 1 : index
    %c0_14 = arith.constant 0 : index
    %c0_15 = arith.constant 0 : index
    %20 = vector.load %arg4[%c1, %c0_14, %c0_15] : memref<6x128x128xbf16, #tpu.memory_space<vmem>>, vector<1x128x128xbf16>
    %21 = vector.shape_cast %20 : vector<1x128x128xbf16> to vector<128x128xbf16>
    %cst_16 = arith.constant dense<0.000000e+00> : vector<8x128xf32>
    %22 = tpu.matmul %19, %21, %cst_16 {dimension_numbers = #tpu.dot_dimension_numbers<[1], [0], [0], [1], [0, 0, 1, 1], [], []>} : vector<8x128xbf16>, vector<128x128xbf16>, vector<8x128xf32> -> vector<8x128xf32>
    %c1_17 = arith.constant 1 : index
    %c0_18 = arith.constant 0 : index
    %c0_19 = arith.constant 0 : index
    %23 = vector.load %arg5[%c1_17, %c0_18, %c0_19] : memref<6x1x128xf32, #tpu.memory_space<vmem>>, vector<1x1x128xf32>
    %24 = vector.shape_cast %23 : vector<1x1x128xf32> to vector<1x128xf32>
    %25 = vector.broadcast %24 : vector<1x128xf32> to vector<8x128xf32>
    %26 = arith.addf %22, %25 : vector<8x128xf32>
    %cst_20 = arith.constant 0.000000e+00 : f32
    %27 = vector.broadcast %cst_20 : f32 to vector<8x128xf32>
    %28 = arith.maximumf %26, %27 : vector<8x128xf32>
    %29 = arith.truncf %28 : vector<8x128xf32> to vector<8x128xbf16>
    %c2 = arith.constant 2 : index
    %c0_21 = arith.constant 0 : index
    %c0_22 = arith.constant 0 : index
    %30 = vector.load %arg4[%c2, %c0_21, %c0_22] : memref<6x128x128xbf16, #tpu.memory_space<vmem>>, vector<1x128x128xbf16>
    %31 = vector.shape_cast %30 : vector<1x128x128xbf16> to vector<128x128xbf16>
    %cst_23 = arith.constant dense<0.000000e+00> : vector<8x128xf32>
    %32 = tpu.matmul %29, %31, %cst_23 {dimension_numbers = #tpu.dot_dimension_numbers<[1], [0], [0], [1], [0, 0, 1, 1], [], []>} : vector<8x128xbf16>, vector<128x128xbf16>, vector<8x128xf32> -> vector<8x128xf32>
    %c2_24 = arith.constant 2 : index
    %c0_25 = arith.constant 0 : index
    %c0_26 = arith.constant 0 : index
    %33 = vector.load %arg5[%c2_24, %c0_25, %c0_26] : memref<6x1x128xf32, #tpu.memory_space<vmem>>, vector<1x1x128xf32>
    %34 = vector.shape_cast %33 : vector<1x1x128xf32> to vector<1x128xf32>
    %35 = vector.broadcast %34 : vector<1x128xf32> to vector<8x128xf32>
    %36 = arith.addf %32, %35 : vector<8x128xf32>
    %cst_27 = arith.constant 0.000000e+00 : f32
    %37 = vector.broadcast %cst_27 : f32 to vector<8x128xf32>
    %38 = arith.maximumf %36, %37 : vector<8x128xf32>
    %39 = arith.truncf %38 : vector<8x128xf32> to vector<8x128xbf16>
    %c3 = arith.constant 3 : index
    %c0_28 = arith.constant 0 : index
    %c0_29 = arith.constant 0 : index
    %40 = vector.load %arg4[%c3, %c0_28, %c0_29] : memref<6x128x128xbf16, #tpu.memory_space<vmem>>, vector<1x128x128xbf16>
    %41 = vector.shape_cast %40 : vector<1x128x128xbf16> to vector<128x128xbf16>
    %cst_30 = arith.constant dense<0.000000e+00> : vector<8x128xf32>
    %42 = tpu.matmul %39, %41, %cst_30 {dimension_numbers = #tpu.dot_dimension_numbers<[1], [0], [0], [1], [0, 0, 1, 1], [], []>} : vector<8x128xbf16>, vector<128x128xbf16>, vector<8x128xf32> -> vector<8x128xf32>
    %c3_31 = arith.constant 3 : index
    %c0_32 = arith.constant 0 : index
    %c0_33 = arith.constant 0 : index
    %43 = vector.load %arg5[%c3_31, %c0_32, %c0_33] : memref<6x1x128xf32, #tpu.memory_space<vmem>>, vector<1x1x128xf32>
    %44 = vector.shape_cast %43 : vector<1x1x128xf32> to vector<1x128xf32>
    %45 = vector.broadcast %44 : vector<1x128xf32> to vector<8x128xf32>
    %46 = arith.addf %42, %45 : vector<8x128xf32>
    %cst_34 = arith.constant 0.000000e+00 : f32
    %47 = vector.broadcast %cst_34 : f32 to vector<8x128xf32>
    %48 = arith.maximumf %46, %47 : vector<8x128xf32>
    %49 = arith.truncf %48 : vector<8x128xf32> to vector<8x128xbf16>
    %c4 = arith.constant 4 : index
    %c0_35 = arith.constant 0 : index
    %c0_36 = arith.constant 0 : index
    %50 = vector.load %arg4[%c4, %c0_35, %c0_36] : memref<6x128x128xbf16, #tpu.memory_space<vmem>>, vector<1x128x128xbf16>
    %51 = vector.shape_cast %50 : vector<1x128x128xbf16> to vector<128x128xbf16>
    %cst_37 = arith.constant dense<0.000000e+00> : vector<8x128xf32>
    %52 = tpu.matmul %49, %51, %cst_37 {dimension_numbers = #tpu.dot_dimension_numbers<[1], [0], [0], [1], [0, 0, 1, 1], [], []>} : vector<8x128xbf16>, vector<128x128xbf16>, vector<8x128xf32> -> vector<8x128xf32>
    %c4_38 = arith.constant 4 : index
    %c0_39 = arith.constant 0 : index
    %c0_40 = arith.constant 0 : index
    %53 = vector.load %arg5[%c4_38, %c0_39, %c0_40] : memref<6x1x128xf32, #tpu.memory_space<vmem>>, vector<1x1x128xf32>
    %54 = vector.shape_cast %53 : vector<1x1x128xf32> to vector<1x128xf32>
    %55 = vector.broadcast %54 : vector<1x128xf32> to vector<8x128xf32>
    %56 = arith.addf %52, %55 : vector<8x128xf32>
    %cst_41 = arith.constant 0.000000e+00 : f32
    %57 = vector.broadcast %cst_41 : f32 to vector<8x128xf32>
    %58 = arith.maximumf %56, %57 : vector<8x128xf32>
    %59 = arith.truncf %58 : vector<8x128xf32> to vector<8x128xbf16>
    %c5 = arith.constant 5 : index
    %c0_42 = arith.constant 0 : index
    %c0_43 = arith.constant 0 : index
    %60 = vector.load %arg4[%c5, %c0_42, %c0_43] : memref<6x128x128xbf16, #tpu.memory_space<vmem>>, vector<1x128x128xbf16>
    %61 = vector.shape_cast %60 : vector<1x128x128xbf16> to vector<128x128xbf16>
    %cst_44 = arith.constant dense<0.000000e+00> : vector<8x128xf32>
    %62 = tpu.matmul %59, %61, %cst_44 {dimension_numbers = #tpu.dot_dimension_numbers<[1], [0], [0], [1], [0, 0, 1, 1], [], []>} : vector<8x128xbf16>, vector<128x128xbf16>, vector<8x128xf32> -> vector<8x128xf32>
    %c5_45 = arith.constant 5 : index
    %c0_46 = arith.constant 0 : index
    %c0_47 = arith.constant 0 : index
    %63 = vector.load %arg5[%c5_45, %c0_46, %c0_47] : memref<6x1x128xf32, #tpu.memory_space<vmem>>, vector<1x1x128xf32>
    %64 = vector.shape_cast %63 : vector<1x1x128xf32> to vector<1x128xf32>
    %65 = vector.broadcast %64 : vector<1x128xf32> to vector<8x128xf32>
    %66 = arith.addf %62, %65 : vector<8x128xf32>
    %cst_48 = arith.constant 0.000000e+00 : f32
    %67 = vector.broadcast %cst_48 : f32 to vector<8x128xf32>
    %68 = arith.maximumf %66, %67 : vector<8x128xf32>
    %69 = arith.truncf %68 : vector<8x128xf32> to vector<8x128xbf16>
    %c0_49 = arith.constant 0 : index
    %c0_50 = arith.constant 0 : index
    %70 = vector.load %arg6[%c0_49, %c0_50] : memref<128x128xbf16, #tpu.memory_space<vmem>>, vector<128x128xbf16>
    %cst_51 = arith.constant dense<0.000000e+00> : vector<8x128xf32>
    %71 = tpu.matmul %69, %70, %cst_51 {dimension_numbers = #tpu.dot_dimension_numbers<[1], [0], [0], [1], [0, 0, 1, 1], [], []>} : vector<8x128xbf16>, vector<128x128xbf16>, vector<8x128xf32> -> vector<8x128xf32>
    %c0_52 = arith.constant 0 : index
    %c0_53 = arith.constant 0 : index
    %72 = vector.load %arg7[%c0_52, %c0_53] : memref<1x128xf32, #tpu.memory_space<vmem>>, vector<1x128xf32>
    %73 = vector.broadcast %72 : vector<1x128xf32> to vector<8x128xf32>
    %74 = arith.addf %71, %73 : vector<8x128xf32>
    %c0_54 = arith.constant 0 : index
    %c0_55 = arith.constant 0 : index
    %75 = vector.load %arg8[%c0_54, %c0_55] : memref<8x128xf32, #tpu.memory_space<vmem>>, vector<8x128xf32>
    tpu.vector_store %arg8[%c0_54, %c0_55], %74 {strides = array<i32>} : memref<8x128xf32, #tpu.memory_space<vmem>>, vector<8x128xf32>,
    return
  }
  func.func @transform_0(%arg0: i32) -> (i32, i32) {
    %c0_i32 = arith.constant 0 : i32
    %c0_i32_0 = arith.constant 0 : i32
    return %arg0, %c0_i32 : i32, i32
  }
  func.func @transform_1(%arg0: i32) -> (i32, i32) {
    %c0_i32 = arith.constant 0 : i32
    %c0_i32_0 = arith.constant 0 : i32
    %c0_i32_1 = arith.constant 0 : i32
    return %c0_i32, %c0_i32_0 : i32, i32
  }
  func.func @transform_2(%arg0: i32) -> (i32, i32) {
    %c0_i32 = arith.constant 0 : i32
    %c0_i32_0 = arith.constant 0 : i32
    %c0_i32_1 = arith.constant 0 : i32
    return %c0_i32, %c0_i32_0 : i32, i32
  }
  func.func @transform_3(%arg0: i32) -> (i32, i32, i32) {
    %c0_i32 = arith.constant 0 : i32
    %c0_i32_0 = arith.constant 0 : i32
    %c0_i32_1 = arith.constant 0 : i32
    %c0_i32_2 = arith.constant 0 : i32
    return %c0_i32, %c0_i32_0, %c0_i32_1 : i32, i32, i32
  }
  func.func @transform_4(%arg0: i32) -> (i32, i32, i32) {
    %c0_i32 = arith.constant 0 : i32
    %c0_i32_0 = arith.constant 0 : i32
    %c0_i32_1 = arith.constant 0 : i32
    %c0_i32_2 = arith.constant 0 : i32
    return %c0_i32, %c0_i32_0, %c0_i32_1 : i32, i32, i32
  }
  func.func @transform_5(%arg0: i32) -> (i32, i32) {
    %c0_i32 = arith.constant 0 : i32
    %c0_i32_0 = arith.constant 0 : i32
    %c0_i32_1 = arith.constant 0 : i32
    return %c0_i32, %c0_i32_0 : i32, i32
  }
  func.func @transform_6(%arg0: i32) -> (i32, i32) {
    %c0_i32 = arith.constant 0 : i32
    %c0_i32_0 = arith.constant 0 : i32
    %c0_i32_1 = arith.constant 0 : i32
    return %c0_i32, %c0_i32_0 : i32, i32
  }
  func.func @transform_7(%arg0: i32) -> (i32, i32) {
    %c0_i32 = arith.constant 0 : i32
    %c0_i32_0 = arith.constant 0 : i32
    return %arg0, %c0_i32 : i32, i32
  }
}

</mosaic_0001>

<bundles_post_ra>
// kernel: tpu_custom_call.1
= control target key start
LH: loop header
LB: loop body
LE: loop exit
PB: predicated region body
PF: predicated region fallthrough
CT: control target
= control target key end

     0   :  { %12 = vsyncpa [#allocation3], 0  ;;  %s1266_s0 = inlined_call_operand.hbm [shape: f32[8,8], index: 0, kind: input, shape index: {}]   ;;  %s1267_s1 = inlined_call_operand.hbm [shape: bf16[8,128], index: 1, kind: input, shape index: {}]   ;;  %s1268_s2 = inlined_call_operand.vmem [shape: f32[1,128], index: 2, kind: input, shape index: {}]   ;;  %s1269_s3 = inlined_call_operand.hbm [shape: bf16[6,128,128], index: 3, kind: input, shape index: {}]   ;;  %s1270_s4 = inlined_call_operand.hbm [shape: f32[6,1,128], index: 4, kind: input, shape index: {}]   ;;  %s1271_s5 = inlined_call_operand.hbm [shape: bf16[128,128], index: 5, kind: input, shape index: {}]   ;;  %s1272_s6 = inlined_call_operand.vmem [shape: f32[1,128], index: 6, kind: input, shape index: {}]   ;;  %s1273_s7 = inlined_call_operand.hbm [shape: f32[8,128], index: 7, kind: output, shape index: {}]  }
   0x1   :  { %13 = vsyncpa [#allocation6], 0 }
   0x2   :  { %14 = vsyncpa [#allocation9], 0  ;;  %s32_s26 = sshll.u32 %s1267_s1, 4  ;;  %s33_s26 = int_to_ptr.hbm [resolvable:$true] %s32_s26 }
   0x3   :  { %15 = vsyncpa [#allocation4], 0  ;;  %s1192_s27 = smov [#allocation5]   ;;  %s57_s8 = sshll.u32 %s1270_s4, 4  ;;  %s58_s8 = int_to_ptr.hbm [resolvable:$true] %s57_s8 }
   0x4   :  { %s34_s28 = sshll.u32 %s1192_s27, 4  ;;  %s1193_s9 = smov [#allocation8]   ;;  %s35_s28 = int_to_ptr.vmem [resolvable:$true] %s34_s28 }
   0x5   :  { %37 = dma.hbm_to_vmem [thread:$0]  %s33_s26, 64, %s35_s28, [#allocation6]  }
   0x6   :  { %s59_s10 = sshll.u32 %s1193_s9, 4  ;;  %s1194_s11 = smov 16   ;;  %s60_s10 = int_to_ptr.vmem [resolvable:$true] %s59_s10 }
   0x7   :  { %s1195_s12 = smov 1   ;;  %s21_s1 = sshll.u32 %s1266_s0, 4  ;;  %s22_s1 = int_to_ptr.hbm [resolvable:$true] %s21_s1 }
   0x8   :  { %65 = dma.hbm_to_vmem [thread:$0]  %s58_s8, 96, %s60_s10, [#allocation9], %s1194_s11, %s1194_s11, %s1195_s12  }
   0x9   :  { %s1196_s15 = smov [#allocation2]   ;;  %s44_s4 = sshll.u32 %s1269_s3, 4  ;;  %s45_s4 = int_to_ptr.hbm [resolvable:$true] %s44_s4 }
   0xa   :  { %s23_s16 = sshll.u32 %s1196_s15, 4  ;;  %s1197_s19 = smov [#allocation7]   ;;  %s24_s16 = int_to_ptr.vmem [resolvable:$true] %s23_s16 }
   0xb   :  { %26 = dma.hbm_to_vmem [thread:$0]  %s22_s1, 128, %s24_s16, [#allocation3]  }
   0xc   :  { %s46_s20 = sshll.u32 %s1197_s19, 4  ;;  %s1198_s21 = smov 64   ;;  %s47_s20 = int_to_ptr.vmem [resolvable:$true] %s46_s20 }
   0xd   :  { %s1199_s22 = smov 4   ;;  %s70_s0 = sshll.u32 %s1271_s5, 4  ;;  %s71_s0 = int_to_ptr.hbm [resolvable:$true] %s70_s0 }
   0xe   :  { %52 = dma.hbm_to_vmem [thread:$0]  %s45_s4, 6144, %s47_s20, [#allocation6], %s1198_s21, %s1198_s21, %s1199_s22  }
   0xf   :  { %s1200_s25 = smov [#allocation10]  }
  0x10   :  { %s72_s26 = sshll.u32 %s1200_s25, 4  ;;  %s73_s26 = int_to_ptr.vmem [resolvable:$true] %s72_s26 }
  0x11   :  { %78 = dma.hbm_to_vmem [thread:$0]  %s71_s0, 1024, %s73_s26, [#allocation9], %s1198_s21, %s1198_s21, %s1199_s22  }
  0x12   :  { %1184 = dma.done.wait [#allocation3], 128  }
  0x13   :  { %1185 = vsyncadd [#allocation3], 4294967168 }
  0x14   :  { %1186 = dma.done.wait [#allocation6], 6208  }
  0x15   :  { %1187 = vsyncadd [#allocation6], 4294961088 }
  0x16   :  { %1188 = dma.done.wait [#allocation9], 1120  }
  0x17   :  { %1189 = vsyncadd [#allocation9], 4294966176  ;;  %vm113_vm0 = vcmask 1043456   ;;  %v104_v0 = vld [vmem:[#allocation5] sm:$0xf]  ;;  %v102_v1 = vld [vmem:[#allocation2] sm:$0xff] }
  0x18   :  { %v973_v2 = vld [vmem:[#allocation7 + $0x38] sm:$0xff]  ;;  %v115_v3 = vsel %vm113_vm0, %v104_v0, 0  ;;  %v103_v4 = vpack.c.bf16 %v102_v1, %v102_v1  ;;  %vm109_vm1 = vcmask 64512   ;;  %v972_v5 = vld [vmem:[#allocation7 + $0x30] sm:$0xff]  ;;  %v971_v6 = vld [vmem:[#allocation7 + $0x28] sm:$0xff]  ;;  %s1201_s28 = smov [#allocation11]  }
  0x19   :  { %124 = vmatpush.bf16.msra.mxu0 %v115_v3  ;;  %200 = vmatpush.bf16.msra.mxu1 %v973_v2  ;;  %v970_v7 = vld [vmem:[#allocation7 + $0x20] sm:$0xff]  ;;  %v969_v8 = vld [vmem:[#allocation7 + $0x18] sm:$0xff]  ;;  %v968_v9 = vld [vmem:[#allocation7 + $0x10] sm:$0xff]  ;;  %s727_s29 = sshll.u32 %s1201_s28, 4  ;;  %s729_s9 = sshll.u32 %s1273_s7, 4  ;;  %s728_s29 = int_to_ptr.vmem [resolvable:$true] %s727_s29  ;;  %s730_s9 = int_to_ptr.hbm [resolvable:$true] %s729_s9 }
  0x1a   :  { %v967_v10 = vld [vmem:[#allocation7 + $0x8] sm:$0xff]  ;;  %v966_v11 = vld [vmem:[#allocation7] sm:$0xff]  ;;  %v981_v12 = vld [vmem:[#allocation7 + $0x78] sm:$0xff] }
  0x1b   :  { %285 = vmatpush.bf16.msra.mxu2 %v981_v12  ;;  %v980_v13 = vld [vmem:[#allocation7 + $0x70] sm:$0xff]  ;;  %v979_v14 = vld [vmem:[#allocation7 + $0x68] sm:$0xff]  ;;  %v978_v15 = vld [vmem:[#allocation7 + $0x60] sm:$0xff] }
  0x1c   :  { %741 = vmatmul.msk.bf16.vlgmr.msra.gmra.mxu0 %vm109_vm1, %v103_v4  ;;  %v977_v16 = vld [vmem:[#allocation7 + $0x58] sm:$0xff]  ;;  %v976_v17 = vld [vmem:[#allocation7 + $0x50] sm:$0xff]  ;;  %v975_v24 = vld [vmem:[#allocation7 + $0x48] sm:$0xff] }
  0x1d   :  { %201 = vmatpush.bf16.msra.mxu1 %v972_v5  ;;  %v1032_v18 = vld [vmem:[%s1268_s2] ss:$0 sm:$0xff]  ;;  %v974_v25 = vld [vmem:[#allocation7 + $0x40] sm:$0xff]  ;;  %v989_v26 = vld [vmem:[#allocation7 + $0xb8] sm:$0xff] }
  0x1e   :  { %370 = vmatpush.bf16.msra.mxu3 %v989_v26  ;;  %v988_v27 = vld [vmem:[#allocation7 + $0xb0] sm:$0xff]  ;;  %v987_v28 = vld [vmem:[#allocation7 + $0xa8] sm:$0xff]  ;;  %v986_v29 = vld [vmem:[#allocation7 + $0xa0] sm:$0xff] }
  0x1f   :  { %286 = vmatpush.bf16.msra.mxu2 %v980_v13  ;;  %v985_v30 = vld [vmem:[#allocation7 + $0x98] sm:$0xff]  ;;  %v984_v31 = vld [vmem:[#allocation7 + $0x90] sm:$0xff]  ;;  %v1033_v32 = vld [vmem:[#allocation8] ss:$0 sm:$0xff] }
  0x20   :  { %v983_v38 = vld [vmem:[#allocation7 + $0x88] sm:$0xff]  ;;  %v982_v39 = vld [vmem:[#allocation7 + $0x80] sm:$0xff]  ;;  %v997_v40 = vld [vmem:[#allocation7 + $0xf8] sm:$0xff] }
  0x21   :  { %202 = vmatpush.bf16.msra.mxu1 %v971_v6  ;;  %455 = vmatpush.bf16.msrb.mxu0 %v997_v40  ;;  %v996_v41 = vld [vmem:[#allocation7 + $0xf0] sm:$0xff]  ;;  %v995_v42 = vld [vmem:[#allocation7 + $0xe8] sm:$0xff]  ;;  %v994_v43 = vld [vmem:[#allocation7 + $0xe0] sm:$0xff] }
  0x22   :  { %371 = vmatpush.bf16.msra.mxu3 %v988_v27  ;;  %v993_v44 = vld [vmem:[#allocation7 + $0xd8] sm:$0xff]  ;;  %v992_v45 = vld [vmem:[#allocation7 + $0xd0] sm:$0xff]  ;;  %v1034_v46 = vld [vmem:[#allocation8 + $0x1] ss:$0 sm:$0xff] }
  0x23   :  { %287 = vmatpush.bf16.msra.mxu2 %v979_v14  ;;  %v991_v52 = vld [vmem:[#allocation7 + $0xc8] sm:$0xff]  ;;  %v990_v53 = vld [vmem:[#allocation7 + $0xc0] sm:$0xff]  ;;  %v1005_v54 = vld [vmem:[#allocation7 + $0x138] sm:$0xff] }
  0x24   :  { %v1004_v55 = vld [vmem:[#allocation7 + $0x130] sm:$0xff]  ;;  %v1003_v56 = vld [vmem:[#allocation7 + $0x128] sm:$0xff]  ;;  %v1002_v57 = vld [vmem:[#allocation7 + $0x120] sm:$0xff] }
  0x25   :  { %203 = vmatpush.bf16.msra.mxu1 %v970_v7  ;;  %456 = vmatpush.bf16.msrb.mxu0 %v996_v41  ;;  %v1001_v58 = vld [vmem:[#allocation7 + $0x118] sm:$0xff]  ;;  %v1000_v59 = vld [vmem:[#allocation7 + $0x110] sm:$0xff]  ;;  %v1035_v60 = vld [vmem:[#allocation8 + $0x2] ss:$0 sm:$0xff] }
  0x26   :  { %372 = vmatpush.bf16.msra.mxu3 %v987_v28  ;;  %v999_v2 = vld [vmem:[#allocation7 + $0x108] sm:$0xff]  ;;  %v998_v3 = vld [vmem:[#allocation7 + $0x100] sm:$0xff]  ;;  %v1013_v4 = vld [vmem:[#allocation7 + $0x178] sm:$0xff] }
  0x27   :  { %288 = vmatpush.bf16.msra.mxu2 %v978_v15  ;;  %v1012_v5 = vld [vmem:[#allocation7 + $0x170] sm:$0xff]  ;;  %v1011_v6 = vld [vmem:[#allocation7 + $0x168] sm:$0xff]  ;;  %v1010_v7 = vld [vmem:[#allocation7 + $0x160] sm:$0xff] }
  0x29   :  { %204 = vmatpush.bf16.msra.mxu1 %v969_v8  ;;  %457 = vmatpush.bf16.msrb.mxu0 %v995_v42  ;;  %v1009_v8 = vld [vmem:[#allocation7 + $0x158] sm:$0xff] }
  0x2a   :  { %373 = vmatpush.bf16.msra.mxu3 %v986_v29 }
  0x2b   :  { %289 = vmatpush.bf16.msra.mxu2 %v977_v16  ;;  %v1007_v16 = vld [vmem:[#allocation7 + $0x148] sm:$0xff] }
  0x2d   :  { %205 = vmatpush.bf16.msra.mxu1 %v968_v9  ;;  %458 = vmatpush.bf16.msrb.mxu0 %v994_v43  ;;  %v1008_v9 = vld [vmem:[#allocation7 + $0x150] sm:$0xff] }
  0x2e   :  { %374 = vmatpush.bf16.msra.mxu3 %v985_v30  ;;  %v1015_v30 = vld [vmem:[#allocation10 + $0x8] sm:$0xff] }
  0x2f   :  { %290 = vmatpush.bf16.msra.mxu2 %v976_v17  ;;  %v1006_v17 = vld [vmem:[#allocation7 + $0x140] sm:$0xff] }
  0x31   :  { %206 = vmatpush.bf16.msra.mxu1 %v967_v10  ;;  %459 = vmatpush.bf16.msrb.mxu0 %v993_v44  ;;  %v1036_v10 = vld [vmem:[#allocation8 + $0x3] ss:$0 sm:$0xff] }
  0x32   :  { %375 = vmatpush.bf16.msra.mxu3 %v984_v31  ;;  %v1014_v31 = vld [vmem:[#allocation10] sm:$0xff] }
  0x33   :  { %291 = vmatpush.bf16.msra.mxu2 %v975_v24  ;;  %v1037_v24 = vld [vmem:[#allocation8 + $0x4] ss:$0 sm:$0xff] }
  0x35   :  { %207 = vmatpush.bf16.msra.mxu1 %v966_v11  ;;  %460 = vmatpush.bf16.msrb.mxu0 %v992_v45 }
  0x36   :  { %376 = vmatpush.bf16.msra.mxu3 %v983_v38  ;;  %v1039_v38 = vld [vmem:[%s1272_s6] ss:$0 sm:$0xff] }
  0x37   :  { %292 = vmatpush.bf16.msra.mxu2 %v974_v25 }
  0x39   :  { %461 = vmatpush.bf16.msrb.mxu0 %v991_v52  ;;  %540 = vmatpush.bf16.msrb.mxu1 %v1005_v54 }
  0x3a   :  { %377 = vmatpush.bf16.msra.mxu3 %v982_v39 }
  0x3b   :  { %625 = vmatpush.bf16.msrb.mxu2 %v1013_v4 }
  0x3d   :  { %462 = vmatpush.bf16.msrb.mxu0 %v990_v53  ;;  %541 = vmatpush.bf16.msrb.mxu1 %v1004_v55 }
  0x3f   :  { %626 = vmatpush.bf16.msrb.mxu2 %v1012_v5 }
  0x41   :  { %542 = vmatpush.bf16.msrb.mxu1 %v1003_v56 }
  0x43   :  { %627 = vmatpush.bf16.msrb.mxu2 %v1011_v6 }
  0x45   :  { %543 = vmatpush.bf16.msrb.mxu1 %v1002_v57 }
  0x47   :  { %628 = vmatpush.bf16.msrb.mxu2 %v1010_v7 }
  0x49   :  { %544 = vmatpush.bf16.msrb.mxu1 %v1001_v58 }
  0x4b   :  { %629 = vmatpush.bf16.msrb.mxu2 %v1009_v8 }
  0x4d   :  { %545 = vmatpush.bf16.msrb.mxu1 %v1000_v59 }
  0x4f   :  { %630 = vmatpush.bf16.msrb.mxu2 %v1008_v9 }
  0x51   :  { %546 = vmatpush.bf16.msrb.mxu1 %v999_v2 }
  0x53   :  { %631 = vmatpush.bf16.msrb.mxu2 %v1007_v16 }
  0x55   :  { %547 = vmatpush.bf16.msrb.mxu1 %v998_v3 }
  0x57   :  { %632 = vmatpush.bf16.msrb.mxu2 %v1006_v17 }
  0x99   :  { %v126_v19 = vpop.f32.mrf.mxu0 }
  0x9a   :  { %v127_v20 = vadd.f32 %v1032_v18, %v126_v19  ;;  %v1021_v18 = vld [vmem:[#allocation10 + $0x38] sm:$0xff]  ;;  %v1020_v19 = vld [vmem:[#allocation10 + $0x30] sm:$0xff] }
  0x9b   :  { %708 = vmatpush.bf16.msrb.mxu3 %v1021_v18 }
  0x9c   :  { %v130_v21 = vmax.f32 %v127_v20, 0.0  ;;  %v1019_v20 = vld [vmem:[#allocation10 + $0x28] sm:$0xff] }
  0x9e   :  { %v131_v22 = vpack.c.bf16 %v130_v21, %v130_v21  ;;  %v1018_v21 = vld [vmem:[#allocation10 + $0x20] sm:$0xff] }
  0x9f   :  { %709 = vmatpush.bf16.msrb.mxu3 %v1020_v19 }
  0xa0   :  { %208 = vmatmul.bf16.vlgmr.msra.gmra.mxu1 %v131_v22  ;;  %v1017_v22 = vld [vmem:[#allocation10 + $0x18] sm:$0xff] }
  0xa1   :  { %v128_v23 = vpop.f32.mrf.mxu0 }
  0xa2   :  { %v1016_v23 = vld [vmem:[#allocation10 + $0x10] sm:$0xff] }
  0xa3   :  { %710 = vmatpush.bf16.msrb.mxu3 %v1019_v20 }
  0xa7   :  { %711 = vmatpush.bf16.msrb.mxu3 %v1018_v21 }
  0xab   :  { %712 = vmatpush.bf16.msrb.mxu3 %v1017_v22 }
  0xaf   :  { %713 = vmatpush.bf16.msrb.mxu3 %v1016_v23 }
  0xb3   :  { %714 = vmatpush.bf16.msrb.mxu3 %v1015_v30 }
  0xb7   :  { %715 = vmatpush.bf16.msrb.mxu3 %v1014_v31 }
 0x11d   :  { %v209_v33 = vpop.f32.mrf.mxu1 }
 0x11e   :  { %v210_v34 = vadd.f32 %v1033_v32, %v209_v33  ;;  %v1038_v32 = vld [vmem:[#allocation8 + $0x5] ss:$0 sm:$0xff] }
 0x120   :  { %v213_v35 = vmax.f32 %v210_v34, 0.0 }
 0x122   :  { %v214_v36 = vpack.c.bf16 %v213_v35, %v213_v35 }
 0x124   :  { %293 = vmatmul.bf16.vlgmr.msra.gmra.mxu2 %v214_v36 }
 0x125   :  { %v211_v37 = vpop.f32.mrf.mxu1 }
 0x1a7   :  { %v294_v47 = vpop.f32.mrf.mxu2 }
 0x1a8   :  { %v295_v48 = vadd.f32 %v1034_v46, %v294_v47 }
 0x1aa   :  { %v298_v49 = vmax.f32 %v295_v48, 0.0 }
 0x1ac   :  { %v299_v50 = vpack.c.bf16 %v298_v49, %v298_v49 }
 0x1ae   :  { %378 = vmatmul.bf16.vlgmr.msra.gmra.mxu3 %v299_v50 }
 0x1af   :  { %v296_v51 = vpop.f32.mrf.mxu2 }
 0x231   :  { %v379_v61 = vpop.f32.mrf.mxu3 }
 0x232   :  { %v380_v62 = vadd.f32 %v1035_v60, %v379_v61 }
 0x234   :  { %v383_v63 = vmax.f32 %v380_v62, 0.0 }
 0x236   :  { %v384_v0 = vpack.c.bf16 %v383_v63, %v383_v63 }
 0x238   :  { %463 = vmatmul.bf16.vlgmr.msrb.gmra.mxu0 %v384_v0 }
 0x239   :  { %v381_v1 = vpop.f32.mrf.mxu3 }
 0x2b5   :  { %v464_v11 = vpop.f32.mrf.mxu0 }
 0x2b6   :  { %v465_v12 = vadd.f32 %v1036_v10, %v464_v11 }
 0x2b8   :  { %v468_v13 = vmax.f32 %v465_v12, 0.0 }
 0x2ba   :  { %v469_v14 = vpack.c.bf16 %v468_v13, %v468_v13 }
 0x2bc   :  { %548 = vmatmul.bf16.vlgmr.msrb.gmra.mxu1 %v469_v14 }
 0x2bd   :  { %v466_v15 = vpop.f32.mrf.mxu0 }
 0x339   :  { %v549_v25 = vpop.f32.mrf.mxu1 }
 0x33a   :  { %v550_v26 = vadd.f32 %v1037_v24, %v549_v25 }
 0x33c   :  { %v553_v27 = vmax.f32 %v550_v26, 0.0 }
 0x33e   :  { %v554_v28 = vpack.c.bf16 %v553_v27, %v553_v27 }
 0x340   :  { %633 = vmatmul.bf16.vlgmr.msrb.gmra.mxu2 %v554_v28 }
 0x341   :  { %v551_v29 = vpop.f32.mrf.mxu1 }
 0x3c3   :  { %v634_v33 = vpop.f32.mrf.mxu2 }
 0x3c4   :  { %v635_v34 = vadd.f32 %v1038_v32, %v634_v33 }
 0x3c6   :  { %v638_v35 = vmax.f32 %v635_v34, 0.0 }
 0x3c8   :  { %v639_v36 = vpack.c.bf16 %v638_v35, %v638_v35 }
 0x3ca   :  { %716 = vmatmul.bf16.vlgmr.msrb.gmra.mxu3 %v639_v36 }
 0x3cb   :  { %v636_v37 = vpop.f32.mrf.mxu2 }
 0x44d   :  { %v717_v39 = vpop.f32.mrf.mxu3 }
 0x44e   :  { %v718_v40 = vadd.f32 %v1039_v38, %v717_v39 }
 0x450   :  { %721 = vst [vmem:[#allocation11] sm:$0xff] %v718_v40 }
 0x451   :  { %732 = dma.vmem_to_hbm [thread:$0]  %s728_s29, 128, %s730_s9, [#allocation4]  }
 0x455   :  { %v719_v41 = vpop.f32.mrf.mxu3 }
 0x456   :  { %1190 = dma.done.wait [#allocation4], 128  }
 0x457   :  { %1191 = vsyncadd [#allocation4], 4294967168 }
 0x458   :  { %737 = vsyncpa [#allocation3], 1 }
 0x459   :  { %738 = vsyncpa [#allocation6], 1 }
 0x45a   :  { %739 = vsyncpa [#allocation9], 1 }
 0x45b   :  { %740 = vsyncpa [#allocation4], 1 }

</bundles_post_ra>
